<compile_context>
chip_gen: v7x
topology: tpu7x:2x2x1
jax: 0.10.0
libtpu: 0.0.40
codegen_flags: <defaults>
</compile_context>

<pallas_src>
import functools

import jax
import jax.numpy as jnp
from jax.experimental import pallas as pl
from jax.experimental.pallas import tpu as pltpu


def _moe_kernel(x_ref, w_ref, b_ref, o_ref, *, num_mixtures, tile_c):
    M = num_mixtures

    # Cast x on the VPU (rides idle slots) instead of a wrapper-side XLA pass.
    xv = x_ref[...]
    if xv.dtype != jnp.bfloat16:
        xv = xv.astype(jnp.bfloat16)

    # One fused bf16 matmul on the MXU with f32 accumulation.
    act = jnp.dot(xv, w_ref[...], preferred_element_type=jnp.float32)

    def slab(s):
        # Mixture slot s -> (TB, tile_c), 128-lane aligned; bias added per slab
        # so we never materialize a second full-width f32 buffer.
        lo = s * tile_c
        return act[:, lo:lo + tile_c] + b_ref[:, lo:lo + tile_c]

    # Gate slabs occupy slots 0..M, expert slabs slots M+1..2M.
    gate = [slab(m) for m in range(M + 1)]

    g_max = gate[0]
    for m in range(1, M + 1):
        g_max = jnp.maximum(g_max, gate[m])

    # Single fused pass: accumulate the softmax denominator AND the
    # sigmoid-weighted numerator together (no exp recomputation).
    denom = jnp.zeros_like(g_max)
    acc = jnp.zeros_like(g_max)
    for m in range(M + 1):
        p = jnp.exp(gate[m] - g_max)
        denom = denom + p
        if m < M:
            acc = acc + p * jax.nn.sigmoid(slab(M + 1 + m))

    o_ref[...] = (acc * pl.reciprocal(denom, approx=True)).astype(o_ref.dtype)


def _vmem_capacity_bytes():
    try:
        return int(pltpu.get_tpu_info().vmem_capacity_bytes)
    except Exception:
        return 64 << 20  # conservative fallback: v7x per-TensorCore VMEM


def _vmem_estimate(tile_b, hidden_dim, n_blk, tile_c, x_itemsize):
    """Double-buffered pipelined blocks + f32 act temp + Mosaic scratch headroom."""
    x_blk = tile_b * hidden_dim * x_itemsize
    w_blk = hidden_dim * n_blk * 2           # bf16 fused weights
    b_blk = n_blk * 4                        # f32 fused bias
    o_blk = tile_b * tile_c * 4              # f32 output tile
    act = tile_b * n_blk * 4                 # f32 matmul result (+ live slabs)
    return 2 * (x_blk + w_blk + b_blk + o_blk) + 2 * act + (4 << 20)


def choose_tile_c(hidden_dim, num_mixtures, *, vmem_cap_bytes=None):
    """Prefer tile_c=256 (256-wide MXU on v6e/v7x) when the VMEM budget allows."""
    cap = vmem_cap_bytes if vmem_cap_bytes is not None else _vmem_capacity_bytes()
    budget = (cap * 5) // 8
    for tc in (256, 128):
        n_blk = (2 * num_mixtures + 1) * tc
        if _vmem_estimate(128, hidden_dim, n_blk, tc, 4) <= budget // 2:
            return tc
    return 128


def permute_params_for_kernel(W_gate, b_gate, W_expert, b_expert, *,
                              num_classes, num_mixtures, tile_c=128):
    """PyTorch-layout params -> fused, class-padded, mixture-major kernel layout.

    Kernel column ((j*(2M+1) + s) * tile_c + c) holds:
      class index  = j*tile_c + c   (zero-padded for c >= num_classes)
      slot s in [0, M]    -> gate  mixture s        (M+1 gate slabs)
      slot s in [M+1, 2M] -> expert mixture s-(M+1) (M   expert slabs)
    """
    C, M = num_classes, num_mixtures
    H = W_gate.shape[1]
    Cp = ((C + tile_c - 1) // tile_c) * tile_c
    J = Cp // tile_c
    pad = Cp - C

    wg = W_gate.T.reshape(H, C, M + 1)       # PyTorch out index c*(M+1)+m
    we = W_expert.T.reshape(H, C, M)         # PyTorch out index c*M+m
    bg = b_gate.reshape(C, M + 1)
    be = b_expert.reshape(C, M)

    wg = jnp.pad(wg, ((0, 0), (0, pad), (0, 0)))
    we = jnp.pad(we, ((0, 0), (0, pad), (0, 0)))
    bg = jnp.pad(bg, ((0, pad), (0, 0)))
    be = jnp.pad(be, ((0, pad), (0, 0)))

    wf = jnp.concatenate(
        [wg.reshape(H, J, tile_c, M + 1), we.reshape(H, J, tile_c, M)], axis=-1)
    wf = wf.transpose(0, 1, 3, 2).reshape(H, J * (2 * M + 1) * tile_c)

    bf = jnp.concatenate(
        [bg.reshape(J, tile_c, M + 1), be.reshape(J, tile_c, M)], axis=-1)
    bf = bf.transpose(0, 2, 1).reshape(1, J * (2 * M + 1) * tile_c)

    # bf16 weights for the MXU fast path; bias stays f32 (added post-acc).
    return wf.astype(jnp.bfloat16), bf.astype(jnp.float32)


def moe_forward(x, w_fused, b_fused, *, num_classes, num_mixtures,
                tile_c=128, tile_b=None, out_dtype=jnp.float32,
                return_padded=False):
    """x: (B, H) f32/bf16.  w_fused: (H, J*(2M+1)*tile_c) bf16.
    b_fused: (1, same) f32.  Returns (B, num_classes) `out_dtype`."""
    B, H = x.shape
    M = num_mixtures
    Cp = ((num_classes + tile_c - 1) // tile_c) * tile_c
    J = Cp // tile_c
    n_blk = (2 * M + 1) * tile_c
    assert tile_c % 128 == 0
    assert w_fused.shape == (H, J * n_blk), w_fused.shape
    assert b_fused.shape == (1, J * n_blk), b_fused.shape

    vmem_cap = _vmem_capacity_bytes()
    budget = (vmem_cap * 5) // 8     # ~40 MiB on 64-MiB v7x, ~80 MiB on v5e/v6e

    if tile_b is None:
        # Multiples of 16 only (full bf16 sublane packing); pick the largest
        # that divides B and fits the corrected VMEM budget.
        cands = [c for c in (1024, 512, 256, 128, 64, 32, 16) if B % c == 0]
        tile_b = next(
            (c for c in cands
             if _vmem_estimate(c, H, n_blk, tile_c, x.dtype.itemsize) <= budget),
            None)
        if tile_b is None:
            tile_b = cands[-1] if cands else B
    assert B % tile_b == 0
    n_batch = B // tile_b

    est = _vmem_estimate(tile_b, H, n_blk, tile_c, x.dtype.itemsize)
    vmem_bytes = int(min(max(est, 32 << 20), budget))

    # Grid order by HBM traffic: the operand whose block index is constant
    # along the INNER grid axis is DMA'd only once (Pallas skips re-fetch of
    # an unchanged block).  Pick the cheaper ordering.
    x_bytes = x.size * x.dtype.itemsize
    w_bytes = w_fused.size * w_fused.dtype.itemsize
    batch_outer = (x_bytes + n_batch * w_bytes) <= (w_bytes + J * x_bytes)

    if batch_outer:   # x loads once; weights re-stream per batch tile
        grid = (n_batch, J)
        x_spec = pl.BlockSpec((tile_b, H), lambda i, j: (i, 0))
        w_spec = pl.BlockSpec((H, n_blk), lambda i, j: (0, j))
        b_spec = pl.BlockSpec((1, n_blk), lambda i, j: (0, j))
        o_spec = pl.BlockSpec((tile_b, tile_c), lambda i, j: (i, j))
    else:             # weights load once; x re-streams per class tile
        grid = (J, n_batch)
        x_spec = pl.BlockSpec((tile_b, H), lambda j, i: (i, 0))
        w_spec = pl.BlockSpec((H, n_blk), lambda j, i: (0, j))
        b_spec = pl.BlockSpec((1, n_blk), lambda j, i: (0, j))
        o_spec = pl.BlockSpec((tile_b, tile_c), lambda j, i: (i, j))

    kernel = functools.partial(_moe_kernel, num_mixtures=M, tile_c=tile_c)

    out_padded = pl.pallas_call(
        kernel,
        out_shape=jax.ShapeDtypeStruct((B, Cp), out_dtype),
        grid_spec=pltpu.PrefetchScalarGridSpec(
            num_scalar_prefetch=0,
            grid=grid,
            in_specs=[x_spec, w_spec, b_spec],
            out_specs=o_spec,
        ),
        compiler_params=pltpu.CompilerParams(
            dimension_semantics=("parallel", "parallel"),
            vmem_limit_bytes=vmem_bytes),
    )(x, w_fused, b_fused)

    if return_padded or Cp == num_classes:
        return out_padded
    return out_padded[:, :num_classes]


def moe_reference(x, W_gate, b_gate, W_expert, b_expert, *, num_classes, num_mixtures):
    """Pure-JAX (f32) replica of the PyTorch forward for verification."""
    C, M = num_classes, num_mixtures
    gate_act = x @ W_gate.T + b_gate
    expert_act = x @ W_expert.T + b_expert
    gating = jax.nn.softmax(gate_act.reshape(-1, M + 1), axis=1)
    expert = jax.nn.sigmoid(expert_act.reshape(-1, M))
    return jnp.sum(gating[:, :M] * expert, axis=1).reshape(-1, C)


if __name__ == "__main__":
    # Small, MoeModel-consistent shapes.  tile_b=16 gives a multi-step grid
    # (64/16 = 4 batch tiles); the weight-vs-x traffic check puts classes on
    # the outer axis here, so the fused weight is DMA'd exactly once.
    B = 64             # batch rows
    hidden_dim = 32    # Linear input feature dim
    num_classes = 16
    num_mixtures = 4
    tile_b = 16
    tile_c = choose_tile_c(hidden_dim, num_mixtures)   # 256 on v6e/v7x, else 128

    key = jax.random.PRNGKey(0)
    kx, kwg, kbg, kwe, kbe = jax.random.split(key, 5)

    x = jax.random.normal(kx, (B, hidden_dim), dtype=jnp.float32)

    # Deterministic PyTorch-layout params:
    # weight (out_features, in_features), bias (out_features,)
    bound = 1.0 / (hidden_dim ** 0.5)
    W_gate = jax.random.uniform(kwg, (num_classes * (num_mixtures + 1), hidden_dim),
                                minval=-bound, maxval=bound, dtype=jnp.float32)
    b_gate = jax.random.uniform(kbg, (num_classes * (num_mixtures + 1),),
                                minval=-bound, maxval=bound, dtype=jnp.float32)
    W_expert = jax.random.uniform(kwe, (num_classes * num_mixtures, hidden_dim),
                                  minval=-bound, maxval=bound, dtype=jnp.float32)
    b_expert = jax.random.uniform(kbe, (num_classes * num_mixtures,),
                                  minval=-bound, maxval=bound, dtype=jnp.float32)

    w_fused, b_fused = permute_params_for_kernel(
        W_gate, b_gate, W_expert, b_expert,
        num_classes=num_classes, num_mixtures=num_mixtures, tile_c=tile_c)

    out = moe_forward(x, w_fused, b_fused,
                      num_classes=num_classes, num_mixtures=num_mixtures,
                      tile_c=tile_c, tile_b=tile_b)
    out = jax.block_until_ready(out)

    ref = moe_reference(x, W_gate, b_gate, W_expert, b_expert,
                        num_classes=num_classes, num_mixtures=num_mixtures)

    assert out.shape == (B, num_classes), out.shape
    max_err = float(jnp.max(jnp.abs(out - ref)))
    # bf16 matmul + approx reciprocal vs a pure-f32 reference: loose tolerance.
    assert max_err < 2e-2, max_err
    print("KERNEL_OK")
</pallas_src>

<mosaic_0001>
module attributes {stable_mosaic.version = 11 : i64} {
  func.func @_moe_kernel(%arg0: i32, %arg1: i32, %arg2: memref<16x32xf32, #tpu.memory_space<vmem>>, %arg3: memref<32x2304xbf16, #tpu.memory_space<vmem>>, %arg4: memref<1x2304xf32, #tpu.memory_space<vmem>>, %arg5: memref<16x256xf32, #tpu.memory_space<vmem>>) attributes {dimension_semantics = [#tpu.dimension_semantics<parallel>, #tpu.dimension_semantics<parallel>], iteration_bounds = array<i64: 1, 4>, scalar_prefetch = 0 : i64, scratch_operands = 0 : i64, tpu.core_type = #tpu.core_type<tc>, window_params = [{transform_indices = @transform_0, window_bounds = array<i64: 16, 32>}, {transform_indices = @transform_1, window_bounds = array<i64: 32, 2304>}, {transform_indices = @transform_2, window_bounds = array<i64: 1, 2304>}, {transform_indices = @transform_3, window_bounds = array<i64: 16, 256>}]} {
    %c0 = arith.constant 0 : index
    %c0_0 = arith.constant 0 : index
    %0 = vector.load %arg2[%c0, %c0_0] : memref<16x32xf32, #tpu.memory_space<vmem>>, vector<16x32xf32>
    %1 = arith.truncf %0 : vector<16x32xf32> to vector<16x32xbf16>
    %c0_1 = arith.constant 0 : index
    %c0_2 = arith.constant 0 : index
    %2 = vector.load %arg3[%c0_1, %c0_2] : memref<32x2304xbf16, #tpu.memory_space<vmem>>, vector<32x2304xbf16>
    %cst = arith.constant dense<0.000000e+00> : vector<16x2304xf32>
    %3 = tpu.matmul %1, %2, %cst {dimension_numbers = #tpu.dot_dimension_numbers<[1], [0], [0], [1], [0, 0, 1, 1], [], []>} : vector<16x32xbf16>, vector<32x2304xbf16>, vector<16x2304xf32> -> vector<16x2304xf32>
    %4 = vector.extract_strided_slice %3 {offsets = [0, 0], sizes = [16, 256], strides = [1, 1]} : vector<16x2304xf32> to vector<16x256xf32>
    %c0_3 = arith.constant 0 : index
    %c0_4 = arith.constant 0 : index
    %5 = vector.load %arg4[%c0_3, %c0_4] : memref<1x2304xf32, #tpu.memory_space<vmem>>, vector<1x256xf32>
    %6 = vector.broadcast %5 : vector<1x256xf32> to vector<16x256xf32>
    %7 = arith.addf %4, %6 : vector<16x256xf32>
    %8 = vector.extract_strided_slice %3 {offsets = [0, 256], sizes = [16, 256], strides = [1, 1]} : vector<16x2304xf32> to vector<16x256xf32>
    %c0_5 = arith.constant 0 : index
    %c256 = arith.constant 256 : index
    %9 = vector.load %arg4[%c0_5, %c256] : memref<1x2304xf32, #tpu.memory_space<vmem>>, vector<1x256xf32>
    %10 = vector.broadcast %9 : vector<1x256xf32> to vector<16x256xf32>
    %11 = arith.addf %8, %10 : vector<16x256xf32>
    %12 = vector.extract_strided_slice %3 {offsets = [0, 512], sizes = [16, 256], strides = [1, 1]} : vector<16x2304xf32> to vector<16x256xf32>
    %c0_6 = arith.constant 0 : index
    %c512 = arith.constant 512 : index
    %13 = vector.load %arg4[%c0_6, %c512] : memref<1x2304xf32, #tpu.memory_space<vmem>>, vector<1x256xf32>
    %14 = vector.broadcast %13 : vector<1x256xf32> to vector<16x256xf32>
    %15 = arith.addf %12, %14 : vector<16x256xf32>
    %16 = vector.extract_strided_slice %3 {offsets = [0, 768], sizes = [16, 256], strides = [1, 1]} : vector<16x2304xf32> to vector<16x256xf32>
    %c0_7 = arith.constant 0 : index
    %c768 = arith.constant 768 : index
    %17 = vector.load %arg4[%c0_7, %c768] : memref<1x2304xf32, #tpu.memory_space<vmem>>, vector<1x256xf32>
    %18 = vector.broadcast %17 : vector<1x256xf32> to vector<16x256xf32>
    %19 = arith.addf %16, %18 : vector<16x256xf32>
    %20 = vector.extract_strided_slice %3 {offsets = [0, 1024], sizes = [16, 256], strides = [1, 1]} : vector<16x2304xf32> to vector<16x256xf32>
    %c0_8 = arith.constant 0 : index
    %c1024 = arith.constant 1024 : index
    %21 = vector.load %arg4[%c0_8, %c1024] : memref<1x2304xf32, #tpu.memory_space<vmem>>, vector<1x256xf32>
    %22 = vector.broadcast %21 : vector<1x256xf32> to vector<16x256xf32>
    %23 = arith.addf %20, %22 : vector<16x256xf32>
    %24 = arith.maximumf %7, %11 : vector<16x256xf32>
    %25 = arith.maximumf %24, %15 : vector<16x256xf32>
    %26 = arith.maximumf %25, %19 : vector<16x256xf32>
    %27 = arith.maximumf %26, %23 : vector<16x256xf32>
    %cst_9 = arith.constant 0.000000e+00 : f32
    %28 = vector.broadcast %cst_9 : f32 to vector<16x256xf32>
    %cst_10 = arith.constant 0.000000e+00 : f32
    %29 = vector.broadcast %cst_10 : f32 to vector<16x256xf32>
    %30 = arith.subf %7, %27 : vector<16x256xf32>
    %31 = math.exp %30 : vector<16x256xf32>
    %32 = arith.addf %28, %31 : vector<16x256xf32>
    %33 = vector.extract_strided_slice %3 {offsets = [0, 1280], sizes = [16, 256], strides = [1, 1]} : vector<16x2304xf32> to vector<16x256xf32>
    %c0_11 = arith.constant 0 : index
    %c1280 = arith.constant 1280 : index
    %34 = vector.load %arg4[%c0_11, %c1280] : memref<1x2304xf32, #tpu.memory_space<vmem>>, vector<1x256xf32>
    %35 = vector.broadcast %34 : vector<1x256xf32> to vector<16x256xf32>
    %36 = arith.addf %33, %35 : vector<16x256xf32>
    %37 = arith.negf %36 : vector<16x256xf32>
    %38 = math.exp %37 : vector<16x256xf32>
    %cst_12 = arith.constant 1.000000e+00 : f32
    %39 = vector.broadcast %cst_12 : f32 to vector<16x256xf32>
    %40 = arith.addf %39, %38 : vector<16x256xf32>
    %41 = arith.divf %39, %40 : vector<16x256xf32>
    %42 = arith.mulf %31, %41 : vector<16x256xf32>
    %43 = arith.addf %29, %42 : vector<16x256xf32>
    %44 = arith.subf %11, %27 : vector<16x256xf32>
    %45 = math.exp %44 : vector<16x256xf32>
    %46 = arith.addf %32, %45 : vector<16x256xf32>
    %47 = vector.extract_strided_slice %3 {offsets = [0, 1536], sizes = [16, 256], strides = [1, 1]} : vector<16x2304xf32> to vector<16x256xf32>
    %c0_13 = arith.constant 0 : index
    %c1536 = arith.constant 1536 : index
    %48 = vector.load %arg4[%c0_13, %c1536] : memref<1x2304xf32, #tpu.memory_space<vmem>>, vector<1x256xf32>
    %49 = vector.broadcast %48 : vector<1x256xf32> to vector<16x256xf32>
    %50 = arith.addf %47, %49 : vector<16x256xf32>
    %51 = arith.negf %50 : vector<16x256xf32>
    %52 = math.exp %51 : vector<16x256xf32>
    %cst_14 = arith.constant 1.000000e+00 : f32
    %53 = vector.broadcast %cst_14 : f32 to vector<16x256xf32>
    %54 = arith.addf %53, %52 : vector<16x256xf32>
    %55 = arith.divf %53, %54 : vector<16x256xf32>
    %56 = arith.mulf %45, %55 : vector<16x256xf32>
    %57 = arith.addf %43, %56 : vector<16x256xf32>
    %58 = arith.subf %15, %27 : vector<16x256xf32>
    %59 = math.exp %58 : vector<16x256xf32>
    %60 = arith.addf %46, %59 : vector<16x256xf32>
    %61 = vector.extract_strided_slice %3 {offsets = [0, 1792], sizes = [16, 256], strides = [1, 1]} : vector<16x2304xf32> to vector<16x256xf32>
    %c0_15 = arith.constant 0 : index
    %c1792 = arith.constant 1792 : index
    %62 = vector.load %arg4[%c0_15, %c1792] : memref<1x2304xf32, #tpu.memory_space<vmem>>, vector<1x256xf32>
    %63 = vector.broadcast %62 : vector<1x256xf32> to vector<16x256xf32>
    %64 = arith.addf %61, %63 : vector<16x256xf32>
    %65 = arith.negf %64 : vector<16x256xf32>
    %66 = math.exp %65 : vector<16x256xf32>
    %cst_16 = arith.constant 1.000000e+00 : f32
    %67 = vector.broadcast %cst_16 : f32 to vector<16x256xf32>
    %68 = arith.addf %67, %66 : vector<16x256xf32>
    %69 = arith.divf %67, %68 : vector<16x256xf32>
    %70 = arith.mulf %59, %69 : vector<16x256xf32>
    %71 = arith.addf %57, %70 : vector<16x256xf32>
    %72 = arith.subf %19, %27 : vector<16x256xf32>
    %73 = math.exp %72 : vector<16x256xf32>
    %74 = arith.addf %60, %73 : vector<16x256xf32>
    %75 = vector.extract_strided_slice %3 {offsets = [0, 2048], sizes = [16, 256], strides = [1, 1]} : vector<16x2304xf32> to vector<16x256xf32>
    %c0_17 = arith.constant 0 : index
    %c2048 = arith.constant 2048 : index
    %76 = vector.load %arg4[%c0_17, %c2048] : memref<1x2304xf32, #tpu.memory_space<vmem>>, vector<1x256xf32>
    %77 = vector.broadcast %76 : vector<1x256xf32> to vector<16x256xf32>
    %78 = arith.addf %75, %77 : vector<16x256xf32>
    %79 = arith.negf %78 : vector<16x256xf32>
    %80 = math.exp %79 : vector<16x256xf32>
    %cst_18 = arith.constant 1.000000e+00 : f32
    %81 = vector.broadcast %cst_18 : f32 to vector<16x256xf32>
    %82 = arith.addf %81, %80 : vector<16x256xf32>
    %83 = arith.divf %81, %82 : vector<16x256xf32>
    %84 = arith.mulf %73, %83 : vector<16x256xf32>
    %85 = arith.addf %71, %84 : vector<16x256xf32>
    %86 = arith.subf %23, %27 : vector<16x256xf32>
    %87 = math.exp %86 : vector<16x256xf32>
    %88 = arith.addf %74, %87 : vector<16x256xf32>
    %89 = tpu.reciprocal %88 {approx = true} : vector<16x256xf32> -> vector<16x256xf32>
    %90 = arith.mulf %85, %89 : vector<16x256xf32>
    %c0_19 = arith.constant 0 : index
    %c0_20 = arith.constant 0 : index
    %91 = vector.load %arg5[%c0_19, %c0_20] : memref<16x256xf32, #tpu.memory_space<vmem>>, vector<16x256xf32>
    tpu.vector_store %arg5[%c0_19, %c0_20], %90 {strides = array<i32>} : memref<16x256xf32, #tpu.memory_space<vmem>>, vector<16x256xf32>,
    return
  }
  func.func @transform_0(%arg0: i32, %arg1: i32) -> (i32, i32) {
    %c0_i32 = arith.constant 0 : i32
    %c0_i32_0 = arith.constant 0 : i32
    return %arg1, %c0_i32 : i32, i32
  }
  func.func @transform_1(%arg0: i32, %arg1: i32) -> (i32, i32) {
    %c0_i32 = arith.constant 0 : i32
    %c0_i32_0 = arith.constant 0 : i32
    return %c0_i32, %arg0 : i32, i32
  }
  func.func @transform_2(%arg0: i32, %arg1: i32) -> (i32, i32) {
    %c0_i32 = arith.constant 0 : i32
    %c0_i32_0 = arith.constant 0 : i32
    return %c0_i32, %arg0 : i32, i32
  }
  func.func @transform_3(%arg0: i32, %arg1: i32) -> (i32, i32) {
    %c0_i32 = arith.constant 0 : i32
    return %arg1, %arg0 : i32, i32
  }
}

</mosaic_0001>

<bundles_post_ra>
// kernel: tpu_custom_call.1
= control target key start
LH: loop header
LB: loop body
LE: loop exit
PB: predicated region body
PF: predicated region fallthrough
CT: control target
= control target key end

     0   :  { %8 = vsyncpa [#allocation3], 0  ;;  %s2223_s0 = inlined_call_operand.vmem [shape: f32[64,32], index: 0, kind: input, shape index: {}]   ;;  %s2224_s1 = inlined_call_operand.hbm [shape: bf16[32,2304], index: 1, kind: input, shape index: {}]   ;;  %s2225_s2 = inlined_call_operand.vmem [shape: f32[1,2304], index: 2, kind: input, shape index: {}]   ;;  %s2226_s3 = inlined_call_operand.hbm [shape: f32[64,256], index: 3, kind: output, shape index: {}]  }
   0x1   :  { %9 = vsyncpa [#allocation4], 0 }
   0x2   :  { %11 = vsyncpa [#allocation4 + $0x1], 0  ;;  %s1793_s12 = smov 0   ;;  %s1795_s13 = smov 0  }
   0x3   :  { %s1797_s14 = smov 0   ;;  %s1799_s15 = smov 0  }
   0x4   :  { %s1801_s16 = smov 0   ;;  %s1803_s17 = smov 0  }
   0x5 LB: > { %s1337_s18 = sadd.s32 4294967295, %s1764_s17   ;;  %s1338_s19 = sadd.s32 4294967294, %s1764_s17   ;;  %s1764_s17 = sphi %s1803_s17, %s17_s17   ;;  %s1760_s16 = sphi %s1801_s16, %s2244_s16   ;;  %s1756_s15 = sphi %s1799_s15, %s2243_s15   ;;  %s1752_s14 = sphi %s1797_s14, %s2242_s14   ;;  %s1748_s13 = sphi %s1795_s13, %s2241_s13   ;;  %s1744_s12 = sphi %s1793_s12, %s2240_s12  }
   0x6   : > { %s26_s20 = sadd.s32 1, %s1760_s16  ;;  %s116_s21 = sadd.s32 1, %s1752_s14 }
   0x7   : > { %p27_p0 = scmp.ge.s32.totalorder %s26_s20, 4  ;;  %p126_p1 = scmp.ne.s32.totalorder %s1752_s14, %s1748_s13 }
   0x8   : > { %p127_p2 = scmp.eq.s32.totalorder %s1337_s18, 3  ;;  %p132_p3 = scmp.ne.s32.totalorder %s1748_s13, %s1744_s12 }
   0x9   : > { %s2246_s20 = smov (%p27_p0, %s26_s20), 0  ;;  %p133_p5 = scmp.eq.s32.totalorder %s1338_s19, 3 }
   0xa   : > { %p1833_p4 = por %p127_p2, %p126_p1  ;;  %s111_s23 = ssub.s32 %s1760_s16, %s2246_s20 }
   0xb   : > { %p1339_p6 = scmp.ge.s32.totalorder %s1764_s17, 1  ;;  %p114_p7 = scmp.eq.s32.totalorder %s111_s23, 0 }
   0xc   : > { %s2231_s22 = scalar_select %p1833_p4, 1, 0 }
   0xd   : > { %p1840_p8 = por %p133_p5, %p132_p3  ;;  %p140_p9 = scmp.lt.s32.totalorder %s1764_s17, 5 }
   0xe   : > { %s1846_s25 = scalar_select %p114_p7, %s1752_s14, %s116_s21  }
   0xf   : > { %s2232_s24 = scalar_select %p1840_p8, 1, 0 }
  0x10   : > { %p1848_p10 = pnand %p1339_p6, %p140_p9  ;;  %p1852_p11 = scmp.eq.s32.totalorder %s1337_s18, 0 }
  0x11   : > { %s1766_s28 = smov [#allocation2]   ;;  %s1654_s6 = scalar_lea.hbm %s2224_s1, 4608 }
  0x12   : > { %s2233_s26 = scalar_select %p1848_p10, 1, 0 }
  0x13   : > { %s2234_s27 = scalar_select %p1852_p11, 1, 0 }
  0x14   : > { %p1423_p12 = pneg %p1848_p10  ;;  %s155_s29 = sshll.u32 %s1766_s28, 4  ;;  %s156_s29 = int_to_ptr.vmem [resolvable:$true] %s155_s29 }
  0x15   : > { %p1655_p0 = scmp.ne.s32.totalorder %s2224_s1, %s1654_s6  ;;  %p1661_p5 = scmp.lt.u32.totalorder %s1654_s6, %s2224_s1 }
  0x16   : > { %p1860_p13 = pnand %p1852_p11, %p1423_p12 }
  0x18   : > { %p1656_p1 = pneg %p1860_p13 }
  0x1a   : > { %p1657_p2 = pnand %p1656_p1, %p1655_p0 }
  0x1c   : > { %p1658_p3 = pneg %p1657_p2 }
  0x1e   : > { %p1663_p6 = pnand %p1661_p5, %p1658_p3 }
  0x20   : > { %1666 = shalt.err (!%p1663_p6)
}
  0x21   : > { %s1667_s11 = scalar_lea.vmem %s156_s29, 4608  ;;  %p1675_p8 = scmp.lt.s32.totalorder %s156_s29, %s156_s29 }
  0x22   : > { %p1668_p7 = scmp.ne.s32.totalorder %s156_s29, %s1667_s11  ;;  %p1676_p4 = scmp.lt.s32.totalorder %s1667_s11, %s1667_s11 }
  0x24   : > { %p1670_p9 = pnand %p1668_p7, %p1656_p1  ;;  %p1677_p11 = por %p1676_p4, %p1675_p8 }
  0x26   : > { %p1671_p12 = pneg %p1670_p9 }
  0x28   : > { %p1678_p10 = pnand %p1677_p11, %p1671_p12 }
  0x2a   : > { %1681 = shalt.err (!%p1678_p10)
}
  0x2b   : > { %s1767_s18 = smov 1152   ;;  %s1768_s19 = smov 72  }
  0x2c   : > { %1426 = dma.hbm_to_vmem [thread:$0]  (!%p1860_p13), %s2224_s1, 4608, %s156_s29, [#allocation3], %s1767_s18, %s1767_s18, %s1768_s19  }
  0x2d   : > { %p2236_p0 = scmp.ne.s32.totalorder %s2233_s26, 0 }
  0x2e   : > { %p2237_p2 = scmp.ne.s32.totalorder (!%p2236_p0), %s2234_s27, 0 }
  0x2f   : > { %188 = sbr.rel (%p2236_p0) target bundleno = 397 (0x18d), region = 32 }
  0x36   : > { %1735 = dma.done.wait (%p2237_p2), [#allocation3], 4608  }
  0x37   : > { %1737 = vsyncadd (%p2237_p2), [#allocation3], 4294962688  ;;  %s1346_s28 = sshll.u32 %s1756_s15, 1  ;;  %v1769_v0 = vmov 0   ;;  %v1488_v1 = vld [vmem:[#allocation2 + $0x4] ss:$72 sps:$4 sm:$0xff]   ;;  %v843_v40 = vlaneseq }
  0x38   : > { %486 = vmatprep.mubr.bf16.mxu0 %v1769_v0  ;;  %529 = vmatprep.mubr.bf16.mxu1 %v1769_v0  ;;  %p217_p4 = scmp.lt.s32.totalorder %s1346_s28, 7  ;;  %v1490_v2 = vld [vmem:[#allocation2 + $0xc] ss:$72 sps:$4 sm:$0xff]   ;;  %v1492_v3 = vld [vmem:[#allocation2] ss:$72 sps:$4 sm:$0xff]   ;;  %vm450_vm0 = vcmask 261120  }
  0x39   : > { %454 = vmatprep.subr.bf16.mxu0 %v1488_v1  ;;  %v1493_v4 = vld [vmem:[#allocation2 + $0x8] ss:$72 sps:$4 sm:$0xff]   ;;  %497 = vmatprep.subr.bf16.mxu1 %v1490_v2  ;;  %v1494_v5 = vld [vmem:[#allocation2 + $0x94] ss:$72 sps:$4 sm:$0xff]   ;;  %v1499_v8 = vld [vmem:[#allocation2 + $0x98] ss:$72 sps:$4 sm:$0xff]  }
  0x3a   : > { %s2248_s28 = smov (!%p217_p4, %s1346_s28), 7  ;;  %455 = vmatpush1.bf16.msra.mxu0 %v1492_v3  ;;  %498 = vmatpush1.bf16.msra.mxu1 %v1493_v4  ;;  %v1496_v6 = vld [vmem:[#allocation2 + $0x9c] ss:$72 sps:$4 sm:$0xff]   ;;  %v1498_v7 = vld [vmem:[#allocation2 + $0x90] ss:$72 sps:$4 sm:$0xff]   ;;  %v844_v41 = vshrl.u32 %v843_v40, 7 }
  0x3b   : > { %s1347_s30 = sshll.u32 %s2248_s28, 3  ;;  %456 = vmatprep.subr.bf16.mxu0 %v1494_v5  ;;  %499 = vmatprep.subr.bf16.mxu1 %v1496_v6  ;;  %v1500_v11 = vld [vmem:[#allocation2 + $0x10] ss:$72 sps:$4 sm:$0xff]   ;;  %v1502_v13 = vld [vmem:[#allocation2 + $0x14] ss:$72 sps:$4 sm:$0xff]   ;;  %s213_s5 = sand.u32 1, %s1748_s13  }
  0x3c   : > { %s220_s27 = scalar_lea.vmem %s2223_s0, %s1347_s30  ;;  %v1503_v14 = vld [vmem:[#allocation2 + $0x18] ss:$72 sps:$4 sm:$0xff]   ;;  %v1505_v15 = vld [vmem:[#allocation2 + $0x1c] ss:$72 sps:$4 sm:$0xff]   ;;  %v1511_v17 = vld [vmem:[#allocation2 + $0xac] ss:$72 sps:$4 sm:$0xff]  }
  0x3d   : > { %v231_v9 = vld [vmem:[%s220_s27] sm:$0xff]  ;;  %v232_v10 = vld [vmem:[%s220_s27 + $0x8] sm:$0xff]  ;;  %v1520_v24 = vld [vmem:[#allocation2 + $0xb4] ss:$72 sps:$4 sm:$0xff]   ;;  %v1919_v42 = vsub.s32 0, %v844_v41  ;;  %v1927_v45 = vsub.s32 1, %v844_v41 }
  0x3e   : > { %v1892_v12 = vpack.c.bf16 %v232_v10, %v231_v9  ;;  %457 = vmatpush1.bf16.msra.mxu0 %v1498_v7  ;;  %500 = vmatpush1.bf16.msra.mxu1 %v1499_v8  ;;  %v1508_v16 = vld [vmem:[#allocation2 + $0xa4] ss:$72 sps:$4 sm:$0xff]   ;;  %v1506_v18 = vld [vmem:[#allocation2 + $0xa0] ss:$72 sps:$4 sm:$0xff]   ;;  %v1518_v26 = vld [vmem:[#allocation2 + $0xb0] ss:$72 sps:$4 sm:$0xff]  }
  0x3f   : > { %540 = vmatprep.subr.bf16.mxu0 %v1502_v13  ;;  %583 = vmatprep.subr.bf16.mxu1 %v1505_v15  ;;  %v1509_v19 = vld [vmem:[#allocation2 + $0xa8] ss:$72 sps:$4 sm:$0xff]   ;;  %v1514_v20 = vld [vmem:[#allocation2 + $0x24] ss:$72 sps:$4 sm:$0xff]   ;;  %v1521_v27 = vld [vmem:[#allocation2 + $0xb8] ss:$72 sps:$4 sm:$0xff]  }
  0x40   : > { %v1517_v21 = vld [vmem:[#allocation2 + $0x2c] ss:$72 sps:$4 sm:$0xff]   ;;  %v1512_v22 = vld [vmem:[#allocation2 + $0x20] ss:$72 sps:$4 sm:$0xff]   ;;  %v1523_v25 = vld [vmem:[#allocation2 + $0xbc] ss:$72 sps:$4 sm:$0xff]  }
  0x41   : > { %1384 = vmatmul.mubr.msk.bf16.vlgmr.msra.gmra.mrb[0].mxu0 %vm450_vm0, %v1892_v12  ;;  %1385 = vmatmul.mubr.msk.bf16.vlgmr.msra.gmra.mrb[0].mxu1 %vm450_vm0, %v1892_v12  ;;  %v1515_v23 = vld [vmem:[#allocation2 + $0x28] ss:$72 sps:$4 sm:$0xff]   ;;  %v1526_v28 = vld [vmem:[#allocation2 + $0x34] ss:$72 sps:$4 sm:$0xff]   ;;  %v1527_v31 = vld [vmem:[#allocation2 + $0x38] ss:$72 sps:$4 sm:$0xff]  }
  0x42   : > { %541 = vmatpush1.bf16.msra.mxu0 %v1500_v11  ;;  %584 = vmatpush1.bf16.msra.mxu1 %v1503_v14  ;;  %v1529_v29 = vld [vmem:[#allocation2 + $0x3c] ss:$72 sps:$4 sm:$0xff]   ;;  %v1524_v30 = vld [vmem:[#allocation2 + $0x30] ss:$72 sps:$4 sm:$0xff]   ;;  %v1535_v33 = vld [vmem:[#allocation2 + $0xcc] ss:$72 sps:$4 sm:$0xff]  }
  0x43   : > { %542 = vmatprep.subr.bf16.mxu0 %v1508_v16  ;;  %585 = vmatprep.subr.bf16.mxu1 %v1511_v17  ;;  %v1532_v32 = vld [vmem:[#allocation2 + $0xc4] ss:$72 sps:$4 sm:$0xff]   ;;  %v1530_v34 = vld [vmem:[#allocation2 + $0xc0] ss:$72 sps:$4 sm:$0xff]   ;;  %v1541_v38 = vld [vmem:[#allocation2 + $0xd4] ss:$72 sps:$4 sm:$0xff]  }
  0x44   : > { %572 = vmatprep.mubr.bf16.mxu0 %v1769_v0  ;;  %615 = vmatprep.mubr.bf16.mxu1 %v1769_v0  ;;  %v1533_v35 = vld [vmem:[#allocation2 + $0xc8] ss:$72 sps:$4 sm:$0xff]   ;;  %v1538_v36 = vld [vmem:[#allocation2 + $0x44] ss:$72 sps:$4 sm:$0xff]   ;;  %v841_v43 = vld [vmem:[%s2225_s2] sm:$0x3] }
  0x45   : > { %v1536_v37 = vld [vmem:[#allocation2 + $0x40] ss:$72 sps:$4 sm:$0xff]   ;;  %v1539_v39 = vld [vmem:[#allocation2 + $0xd0] ss:$72 sps:$4 sm:$0xff]   ;;  %v846_v46 = vrot.slane %v841_v43, %v1919_v42  ;;  %v850_v48 = vrot.slane %v841_v43, %v1927_v45  ;;  %v873_v60 = vld [vmem:[%s2225_s2 + $0x4] sm:$0x3] }
  0x46   : > { %543 = vmatpush1.bf16.msra.mxu0 %v1506_v18  ;;  %586 = vmatpush1.bf16.msra.mxu1 %v1509_v19  ;;  %v857_v44 = vld [vmem:[%s2225_s2 + $0x2] sm:$0x3]  ;;  %v889_v61 = vld [vmem:[%s2225_s2 + $0x6] sm:$0x3]  ;;  %v878_v7 = vrot.slane %v873_v60, %v1919_v42  ;;  %v882_v10 = vrot.slane %v873_v60, %v1927_v45  ;;  %s1345_s6 = sshll.u32 %s213_s5, 5  ;;  %s1416_s8 = sshll.u32 %s1756_s15, 9 }
  0x47   : > { %626 = vmatprep.subr.bf16.mxu0 %v1514_v20  ;;  %669 = vmatprep.subr.bf16.mxu1 %v1517_v21  ;;  %v862_v47 = vrot.slane %v857_v44, %v1919_v42  ;;  %v866_v49 = vrot.slane %v857_v44, %v1927_v45  ;;  %v894_v8 = vrot.slane %v889_v61, %v1919_v42  ;;  %s215_s7 = scalar_lea.vmem [#allocation5], %s1345_s6  ;;  %s2171_s18 = scalar_lea.hbm %s2226_s3, %s1416_s8 }
  0x48   : > { %v898_v11 = vrot.slane %v889_v61, %v1927_v45  ;;  %s1238_s9 = sshll.u32 %s215_s7, 4  ;;  %s2177_s19 = scalar_lea.sflag [#allocation4], %s213_s5  ;;  %s2173_s9 = int_to_ptr.vmem [resolvable:$true] %s1238_s9 }
  0x49   : > { %1386 = vmatmul.mubr.msk.bf16.vlgmr.msra.gmra.mrb[4].mxu0 %vm450_vm0, %v1892_v12  ;;  %1387 = vmatmul.mubr.msk.bf16.vlgmr.msra.gmra.mrb[4].mxu1 %vm450_vm0, %v1892_v12  ;;  %s1682_s21 = scalar_lea.vmem %s2173_s9, 512  ;;  %p2238_p10 = scmp.ne.s32.totalorder %s2231_s22, 0 }
  0x4a   : > { %627 = vmatpush1.bf16.msra.mxu0 %v1512_v22  ;;  %670 = vmatpush1.bf16.msra.mxu1 %v1515_v23  ;;  %v905_v22 = vld [vmem:[%s2225_s2 + $0x8] sm:$0x3]  ;;  %v953_v23 = vld [vmem:[%s2225_s2 + $0xa] sm:$0x3]  ;;  %p1683_p8 = scmp.ne.s32.totalorder %s2173_s9, %s1682_s21  ;;  %s1770_s15 = smov [#allocation5]  }
  0x4b   : > { %628 = vmatprep.subr.bf16.mxu0 %v1520_v24  ;;  %671 = vmatprep.subr.bf16.mxu1 %v1523_v25  ;;  %v2002_v61 = vrot.slane %v953_v23, %v1927_v45  ;;  %s1686_s23 = sshll.u32 %s1770_s15, 4  ;;  %s1687_s23 = int_to_ptr.vmem [resolvable:$false] %s1686_s23 }
  0x4c   : > { %658 = vmatprep.mubr.bf16.mxu0 %v1769_v0  ;;  %701 = vmatprep.mubr.bf16.mxu1 %v1769_v0  ;;  %p1684_p11 = pnand %p1683_p8, %p2238_p10  ;;  %s1688_s28 = scalar_lea.vmem %s1687_s23, 1024 }
  0x4d   : > { %p1689_p1 = scmp.lt.s32.totalorder %s2173_s9, %s1687_s23  ;;  %p1690_p3 = scmp.lt.s32.totalorder %s1688_s28, %s1682_s21 }
  0x4e   : > { %629 = vmatpush1.bf16.msra.mxu0 %v1518_v26  ;;  %672 = vmatpush1.bf16.msra.mxu1 %v1521_v27  ;;  %p1685_p13 = pneg %p1684_p11 }
  0x4f   : > { %712 = vmatprep.subr.bf16.mxu0 %v1526_v28  ;;  %755 = vmatprep.subr.bf16.mxu1 %v1529_v29  ;;  %p1691_p5 = por %p1690_p3, %p1689_p1 }
  0x51   : > { %1388 = vmatmul.mubr.msk.bf16.vlgmr.msra.gmra.mrb[8].mxu0 %vm450_vm0, %v1892_v12  ;;  %1389 = vmatmul.mubr.msk.bf16.vlgmr.msra.gmra.mrb[8].mxu1 %vm450_vm0, %v1892_v12  ;;  %p1692_p6 = pnand %p1691_p5, %p1685_p13 }
  0x52   : > { %713 = vmatpush1.bf16.msra.mxu0 %v1524_v30  ;;  %756 = vmatpush1.bf16.msra.mxu1 %v1527_v31 }
  0x53   : > { %714 = vmatprep.subr.bf16.mxu0 %v1532_v32  ;;  %757 = vmatprep.subr.bf16.mxu1 %v1535_v33 }
  0x54   : > { %744 = vmatprep.mubr.bf16.mxu0 %v1769_v0  ;;  %787 = vmatprep.mubr.bf16.mxu1 %v1769_v0 }
  0x56   : > { %715 = vmatpush1.bf16.msra.mxu0 %v1530_v34  ;;  %758 = vmatpush1.bf16.msra.mxu1 %v1533_v35  ;;  %v910_v34 = vrot.slane %v905_v22, %v1919_v42  ;;  %v1989_v35 = vrot.slane %v953_v23, %v1919_v42 }
  0x57   : > { %798 = vmatprep.subr.bf16.mxu0 %v1538_v36 }
  0x59   : > { %1390 = vmatmul.mubr.msk.bf16.vlgmr.msra.gmra.mrb[12].mxu0 %vm450_vm0, %v1892_v12  ;;  %1391 = vmatmul.mubr.msk.bf16.vlgmr.msra.gmra.mrb[12].mxu1 %vm450_vm0, %v1892_v12 }
  0x5a   : > { %799 = vmatpush1.bf16.msra.mxu0 %v1536_v37  ;;  %830 = vmatprep.mubr.bf16.mxu0 %v1769_v0 }
  0x5b   : > { %800 = vmatprep.subr.bf16.mxu0 %v1541_v38  ;;  %v914_v38 = vrot.slane %v905_v22, %v1927_v45 }
  0x5e   : > { %801 = vmatpush1.bf16.msra.mxu0 %v1539_v39 }
  0x61   : > { %1392 = vmatmul.mubr.msk.bf16.vlgmr.msra.gmra.mrb[16].mxu0 %vm450_vm0, %v1892_v12 }
 0x114   : > { %v488_v50 = vpop.f32.mrb[0].mxu0  ;;  %v531_v51 = vpop.f32.mrb[0].mxu1 }
 0x115   : > { %v1933_v52 = vadd.f32 %v846_v46, %v488_v50  ;;  %v1935_v53 = vadd.f32 %v862_v47, %v531_v51  ;;  %v490_v54 = vpop.f32.mrb[1].mxu0  ;;  %v533_v55 = vpop.f32.mrb[1].mxu1 }
 0x116   : > { %v1937_v56 = vadd.f32 %v850_v48, %v490_v54  ;;  %v1939_v57 = vadd.f32 %v866_v49, %v533_v55  ;;  %v492_v58 = vpop.f32.mrb[2].mxu0  ;;  %v535_v59 = vpop.f32.mrb[2].mxu1 }
 0x117   : > { %v921_v62 = vmax.f32 %v1933_v52, %v1935_v53  ;;  %v1949_v63 = vadd.f32 %v846_v46, %v492_v58  ;;  %v1951_v0 = vadd.f32 %v862_v47, %v535_v59  ;;  %v494_v1 = vpop.f32.mrb[3].mxu0  ;;  %v537_v2 = vpop.f32.mrb[3].mxu1 }
 0x118   : > { %v922_v3 = vmax.f32 %v1937_v56, %v1939_v57  ;;  %v1955_v4 = vadd.f32 %v850_v48, %v494_v1  ;;  %v1957_v5 = vadd.f32 %v866_v49, %v537_v2 }
 0x119   : > { %v923_v6 = vmax.f32 %v1949_v63, %v1951_v0 }
 0x11a   : > { %v924_v9 = vmax.f32 %v1955_v4, %v1957_v5 }
 0x11c   : > { %v574_v12 = vpop.f32.mrb[4].mxu0  ;;  %v617_v13 = vpop.f32.mrb[4].mxu1 }
 0x11d   : > { %v885_v14 = vadd.f32 %v878_v7, %v574_v12  ;;  %v576_v15 = vpop.f32.mrb[5].mxu0  ;;  %v901_v16 = vadd.f32 %v894_v8, %v617_v13  ;;  %v619_v17 = vpop.f32.mrb[5].mxu1 }
 0x11e   : > { %v1967_v18 = vadd.f32 %v882_v10, %v576_v15  ;;  %v578_v19 = vpop.f32.mrb[6].mxu0  ;;  %v1969_v20 = vadd.f32 %v898_v11, %v619_v17  ;;  %v621_v21 = vpop.f32.mrb[6].mxu1 }
 0x11f   : > { %v925_v24 = vmax.f32 %v921_v62, %v885_v14  ;;  %v1977_v25 = vadd.f32 %v878_v7, %v578_v19  ;;  %v580_v26 = vpop.f32.mrb[7].mxu0  ;;  %v1979_v27 = vadd.f32 %v894_v8, %v621_v21  ;;  %v623_v28 = vpop.f32.mrb[7].mxu1 }
 0x120   : > { %v926_v29 = vmax.f32 %v922_v3, %v1967_v18  ;;  %v1982_v30 = vadd.f32 %v882_v10, %v580_v26  ;;  %v1984_v31 = vadd.f32 %v898_v11, %v623_v28 }
 0x121   : > { %v927_v32 = vmax.f32 %v923_v6, %v1977_v25  ;;  %v929_v33 = vmax.f32 %v925_v24, %v901_v16 }
 0x122   : > { %v928_v36 = vmax.f32 %v924_v9, %v1982_v30  ;;  %v930_v37 = vmax.f32 %v926_v29, %v1969_v20 }
 0x123   : > { %v931_v39 = vmax.f32 %v927_v32, %v1979_v27 }
 0x124   : > { %v932_v40 = vmax.f32 %v928_v36, %v1984_v31  ;;  %v660_v41 = vpop.f32.mrb[8].mxu0  ;;  %v703_v43 = vpop.f32.mrb[8].mxu1 }
 0x125   : > { %v917_v44 = vadd.f32 %v910_v34, %v660_v41  ;;  %v965_v46 = vadd.f32 %v1989_v35, %v703_v43  ;;  %v662_v47 = vpop.f32.mrb[9].mxu0  ;;  %v705_v48 = vpop.f32.mrb[9].mxu1 }
 0x126   : > { %v918_v49 = vadd.f32 %v914_v38, %v662_v47  ;;  %v664_v50 = vpop.f32.mrb[10].mxu0  ;;  %v1997_v51 = vpop.f32.mrb[10].mxu1 }
 0x127   : > { %v933_v54 = vmax.f32 %v929_v33, %v917_v44  ;;  %v1393_v55 = vmul.f32 -1.442695, %v965_v46  ;;  %v666_v58 = vpop.f32.mrb[11].mxu0  ;;  %v1999_v59 = vpop.f32.mrb[11].mxu1  ;;  %v2004_v62 = vadd.f32 %v910_v34, %v664_v50 }
 0x128   : > { %v934_v60 = vmax.f32 %v930_v37, %v918_v49  ;;  %v2006_v1 = vadd.f32 %v914_v38, %v666_v58 }
 0x129   : > { %v937_v2 = vsub.f32 %v1933_v52, %v933_v54  ;;  %v1001_v3 = vsub.f32 %v1935_v53, %v933_v54  ;;  %v1065_v6 = vsub.f32 %v885_v14, %v933_v54  ;;  %v1129_v7 = vsub.f32 %v901_v16, %v933_v54 }
 0x12a   : > { %v1193_v8 = vsub.f32 %v917_v44, %v933_v54  ;;  %1542 = vpow2.f32 %v1393_v55  ;;  %v938_v9 = vsub.f32 %v1937_v56, %v934_v60  ;;  %v1002_v10 = vsub.f32 %v1939_v57, %v934_v60 }
 0x12b   : > { %v941_v11 = vmul.f32 1.442695, %v937_v2  ;;  %v1005_v12 = vmul.f32 1.442695, %v1001_v3  ;;  %v1069_v13 = vmul.f32 1.442695, %v1065_v6  ;;  %v1066_v15 = vsub.f32 %v1967_v18, %v934_v60 }
 0x12c   : > { %v1133_v17 = vmul.f32 1.442695, %v1129_v7  ;;  %v1130_v19 = vsub.f32 %v1969_v20, %v934_v60  ;;  %v1197_v52 = vmul.f32 1.442695, %v1193_v8  ;;  %v1194_v21 = vsub.f32 %v918_v49, %v934_v60  ;;  %v2015_v14 = vpop.f32.mrb[12].mxu0  ;;  %v2017_v16 = vpop.f32.mrb[12].mxu1 }
 0x12d   : > { %1544 = vpow2.f32 %v941_v11  ;;  %v966_v53 = vadd.f32 %v2002_v61, %v705_v48  ;;  %v943_v56 = vmul.f32 1.442695, %v938_v9  ;;  %v1007_v57 = vmul.f32 1.442695, %v1002_v10  ;;  %v2020_v23 = vpop.f32.mrb[13].mxu0  ;;  %v2022_v18 = vpop.f32.mrb[13].mxu1 }
 0x12e   : > { %1546 = vpow2.f32 %v1005_v12  ;;  %v935_v22 = vmax.f32 %v931_v39, %v2004_v62  ;;  %v1071_v20 = vmul.f32 1.442695, %v1066_v15  ;;  %v1135_v24 = vmul.f32 1.442695, %v1130_v19  ;;  %v2027_v28 = vpop.f32.mrb[14].mxu0  ;;  %v2029_v29 = vpop.f32.mrb[14].mxu1 }
 0x12f   : > { %1548 = vpow2.f32 %v1069_v13  ;;  %v2025_v26 = vmax.f32 %v932_v40, %v2006_v1  ;;  %v2034_v36 = vpop.f32.mrb[15].mxu0  ;;  %v2036_v37 = vpop.f32.mrb[15].mxu1  ;;  %v1199_v41 = vmul.f32 1.442695, %v1194_v21  ;;  %v1081_v3 = vld [vmem:[%s2225_s2 + $0xe] sm:$0x3] }
 0x130   : > { %1550 = vpow2.f32 %v1133_v17  ;;  %v939_v32 = vsub.f32 %v1949_v63, %v935_v22  ;;  %v1003_v33 = vsub.f32 %v1951_v0, %v935_v22  ;;  %v1067_v34 = vsub.f32 %v1977_v25, %v935_v22 }
 0x131   : > { %1552 = vpow2.f32 %v1197_v52  ;;  %v1131_v38 = vsub.f32 %v1979_v27, %v935_v22  ;;  %v1195_v39 = vsub.f32 %v2004_v62, %v935_v22  ;;  %v940_v40 = vsub.f32 %v1955_v4, %v2025_v26 }
 0x132   : > { %1554 = vpow2.f32 %v943_v56  ;;  %v1394_v63 = vmul.f32 -1.442695, %v966_v53  ;;  %v1004_v0 = vsub.f32 %v1957_v5, %v2025_v26  ;;  %v1068_v25 = vsub.f32 %v1982_v30, %v2025_v26 }
 0x133   : > { %1556 = vpow2.f32 %v1007_v57  ;;  %v1132_v27 = vsub.f32 %v1984_v31, %v2025_v26  ;;  %v945_v4 = vmul.f32 1.442695, %v939_v32  ;;  %v1196_v47 = vsub.f32 %v2006_v1, %v2025_v26 }
 0x134   : > { %v1543_v43 = vpop.eup %1542  ;;  %1558 = vpow2.f32 %v1071_v20  ;;  %v2048_v44 = vpop.f32.mrb[16].mxu0  ;;  %v1009_v49 = vmul.f32 1.442695, %v1003_v33  ;;  %v967_v5 = vadd.f32 %v1989_v35, %v1997_v51  ;;  %v1073_v30 = vmul.f32 1.442695, %v1067_v34 }
 0x135   : > { %v981_v46 = vadd.f32 1.0, %v1543_v43  ;;  %1560 = vpow2.f32 %v1135_v24  ;;  %v2052_v48 = vpop.f32.mrb[17].mxu0  ;;  %v1137_v55 = vmul.f32 1.442695, %v1131_v38  ;;  %v1201_v1 = vmul.f32 1.442695, %v1195_v39 }
 0x136   : > { %1562 = vpow2.f32 %v1199_v41  ;;  %v2056_v54 = vpop.f32.mrb[18].mxu0  ;;  %v1017_v35 = vld [vmem:[%s2225_s2 + $0xc] sm:$0x3]  ;;  %v1395_v2 = vmul.f32 -1.442695, %v967_v5  ;;  %v1086_v15 = vrot.slane %v1081_v3, %v1919_v42  ;;  %v968_v57 = vadd.f32 %v2002_v61, %v1999_v59 }
 0x137   : > { %v1545_v50 = vpop.eup %1544  ;;  %1564 = vrcp.f32 %v981_v46  ;;  %v2060_v58 = vpop.f32.mrb[19].mxu0  ;;  %v947_v8 = vmul.f32 1.442695, %v940_v40  ;;  %v1011_v10 = vmul.f32 1.442695, %v1004_v0  ;;  %v1022_v11 = vrot.slane %v1017_v35, %v1919_v42 }
 0x138   : > { %v2058_v31 = vpop.eup %1546  ;;  %1566 = vpow2.f32 %v1394_v63  ;;  %v1075_v52 = vmul.f32 1.442695, %v1068_v25  ;;  %v1026_v21 = vrot.slane %v1017_v35, %v1927_v45  ;;  %v1090_v22 = vrot.slane %v1081_v3, %v1927_v45 }
 0x139   : > { %v2062_v60 = vpop.eup %1548  ;;  %v1013_v62 = vadd.f32 %v2058_v31, %v1545_v50  ;;  %1568 = vpow2.f32 %v945_v4  ;;  %v1139_v26 = vmul.f32 1.442695, %v1132_v27  ;;  %v1029_v32 = vadd.f32 %v1022_v11, %v2015_v14  ;;  %v1145_v14 = vld [vmem:[%s2225_s2 + $0x10] sm:$0x3] }
 0x13a   : > { %v2068_v51 = vpop.eup %1550  ;;  %1570 = vpow2.f32 %v1009_v49  ;;  %v1203_v34 = vmul.f32 1.442695, %v1196_v47  ;;  %v1093_v38 = vadd.f32 %v1086_v15, %v2017_v16  ;;  %v1030_v59 = vadd.f32 %v1026_v21, %v2020_v23 }
 0x13b   : > { %v1553_v6 = vpop.eup %1552  ;;  %v1077_v7 = vadd.f32 %v2062_v60, %v1013_v62  ;;  %1572 = vpow2.f32 %v1073_v30  ;;  %v1396_v43 = vmul.f32 -1.442695, %v968_v57  ;;  %v1397_v16 = vmul.f32 -1.442695, %v1029_v32 }
 0x13c   : > { %v2074_v9 = vpop.eup %1554  ;;  %1574 = vpow2.f32 %v1137_v55  ;;  %v1094_v27 = vadd.f32 %v1090_v22, %v2022_v18  ;;  %v1401_v4 = vmul.f32 -1.442695, %v1093_v38  ;;  %v1398_v49 = vmul.f32 -1.442695, %v1030_v59 }
 0x13d   : > { %v2077_v12 = vpop.eup %1556  ;;  %v1141_v13 = vadd.f32 %v2068_v51, %v1077_v7  ;;  %1576 = vpow2.f32 %v1201_v1  ;;  %v1031_v5 = vadd.f32 %v1022_v11, %v2027_v28  ;;  %v1095_v18 = vadd.f32 %v1086_v15, %v2029_v29 }
 0x13e   : > { %v2081_v17 = vpop.eup %1558  ;;  %v1014_v19 = vadd.f32 %v2077_v12, %v2074_v9  ;;  %1578 = vpow2.f32 %v1395_v2  ;;  %v1402_v1 = vmul.f32 -1.442695, %v1094_v27  ;;  %v1032_v35 = vadd.f32 %v1026_v21, %v2034_v36 }
 0x13f   : > { %v2086_v53 = vpop.eup %1560  ;;  %v2088_v56 = vadd.f32 %v1553_v6, %v1141_v13  ;;  %1580 = vpow2.f32 %v947_v8  ;;  %v1096_v28 = vadd.f32 %v1090_v22, %v2036_v37  ;;  %v1399_v7 = vmul.f32 -1.442695, %v1031_v5 }
 0x140   : > { %v1563_v20 = vpop.eup %1562  ;;  %v1078_v24 = vadd.f32 %v2081_v17, %v1014_v19  ;;  %1582 = vpow2.f32 %v1011_v10  ;;  %v1403_v10 = vmul.f32 -1.442695, %v1095_v18  ;;  %v1400_v13 = vmul.f32 -1.442695, %v1032_v35 }
 0x141   : > { %v1565_v33 = vpop.eup %1564  ;;  %1584 = vpow2.f32 %v1075_v52  ;;  %v1154_v15 = vrot.slane %v1145_v14, %v1927_v45  ;;  %v1404_v19 = vmul.f32 -1.442695, %v1096_v28 }
 0x142   : > { %v1567_v39 = vpop.eup %1566  ;;  %v2096_v40 = vmul.f32 %v1565_v33, %v1545_v50  ;;  %v1142_v41 = vadd.f32 %v2086_v53, %v1078_v24  ;;  %1586 = vpow2.f32 %v1139_v26  ;;  %v1150_v50 = vrot.slane %v1145_v14, %v1919_v42 }
 0x143   : > { %v2100_v61 = vpop.eup %1568  ;;  %v982_v63 = vadd.f32 1.0, %v1567_v39  ;;  %v1158_v24 = vadd.f32 %v1154_v15, %v2052_v48 }
 0x144   : > { %v2105_v0 = vpop.eup %1570  ;;  %v2107_v25 = vadd.f32 %v1563_v20, %v1142_v41  ;;  %v1157_v8 = vadd.f32 %v1150_v50, %v2048_v44 }
 0x145   : > { %v2110_v46 = vpop.eup %1572  ;;  %1588 = vrcp.f32 %v982_v63  ;;  %v1015_v23 = vadd.f32 %v2105_v0, %v2100_v61  ;;  %v1406_v63 = vmul.f32 -1.442695, %v1158_v24 }
 0x146   : > { %v2114_v47 = vpop.eup %1574  ;;  %1590 = vpow2.f32 %v1203_v34  ;;  %v1405_v44 = vmul.f32 -1.442695, %v1157_v8  ;;  %v1159_v34 = vadd.f32 %v1150_v50, %v2056_v54  ;;  %v1160_v54 = vadd.f32 %v1154_v15, %v2060_v58 }
 0x147   : > { %v1577_v30 = vpop.eup %1576  ;;  %v1079_v55 = vadd.f32 %v2110_v46, %v1015_v23  ;;  %1592 = vpow2.f32 %v1396_v43 }
 0x148   : > { %v1579_v62 = vpop.eup %1578  ;;  %1594 = vpow2.f32 %v1397_v16  ;;  %v1407_v16 = vmul.f32 -1.442695, %v1159_v34 }
 0x149   : > { %v2121_v2 = vpop.eup %1580  ;;  %v1143_v3 = vadd.f32 %v2114_v47, %v1079_v55  ;;  %v983_v6 = vadd.f32 1.0, %v1579_v62  ;;  %1596 = vpow2.f32 %v1401_v4  ;;  %v1408_v62 = vmul.f32 -1.442695, %v1160_v54 }
 0x14a   : > { %v2125_v42 = vpop.eup %1582  ;;  %1598 = vpow2.f32 %v1398_v49 }
 0x14b   : > { %v2128_v29 = vadd.f32 %v1577_v30, %v1143_v3  ;;  %1600 = vrcp.f32 %v983_v6  ;;  %v1016_v36 = vadd.f32 %v2125_v42, %v2121_v2  ;;  %v2132_v11 = vpop.eup %1584 }
 0x14c   : > { %1602 = vpow2.f32 %v1402_v1  ;;  %v2136_v52 = vpop.eup %1586 }
 0x14d   : > { %v1080_v37 = vadd.f32 %v2132_v11, %v1016_v36  ;;  %1604 = vpow2.f32 %v1399_v7 }
 0x14e   : > { %1606 = vpow2.f32 %v1403_v10 }
 0x14f   : > { %v1589_v21 = vpop.eup %1588  ;;  %v1144_v57 = vadd.f32 %v2136_v52, %v1080_v37  ;;  %1608 = vpow2.f32 %v1400_v13 }
 0x150   : > { %v1591_v22 = vpop.eup %1590  ;;  %v994_v20 = vmul.f32 %v1589_v21, %v2074_v9  ;;  %1610 = vpow2.f32 %v1404_v19 }
 0x151   : > { %v1593_v26 = vpop.eup %1592  ;;  %v2141_v32 = vadd.f32 %v1591_v22, %v1144_v57  ;;  %1612 = vpow2.f32 %v1405_v44 }
 0x152   : > { %v1595_v45 = vpop.eup %1594  ;;  %v984_v33 = vadd.f32 1.0, %v1593_v26 }
 0x153   : > { %v1597_v38 = vpop.eup %1596  ;;  %v1045_v39 = vadd.f32 1.0, %v1595_v45 }
 0x154   : > { %v1599_v41 = vpop.eup %1598  ;;  %1614 = vrcp.f32 %v984_v33  ;;  %v1109_v59 = vadd.f32 1.0, %v1597_v38 }
 0x155   : > { %v1601_v43 = vpop.eup %1600  ;;  %1616 = vrcp.f32 %v1045_v39  ;;  %v1046_v9 = vadd.f32 1.0, %v1599_v41 }
 0x156   : > { %v1603_v14 = vpop.eup %1602  ;;  %v995_v48 = vmul.f32 %v1601_v43, %v2100_v61  ;;  %1618 = vrcp.f32 %v1109_v59 }
 0x157   : > { %1620 = vrcp.f32 %v1046_v9  ;;  %v1110_v27 = vadd.f32 1.0, %v1603_v14  ;;  %v1605_v23 = vpop.eup %1604 }
 0x158   : > { %1622 = vpow2.f32 %v1406_v63  ;;  %v1607_v4 = vpop.eup %1606  ;;  %v1047_v49 = vadd.f32 1.0, %v1605_v23 }
 0x159   : > { %1624 = vrcp.f32 %v1110_v27  ;;  %v1609_v5 = vpop.eup %1608  ;;  %v1111_v50 = vadd.f32 1.0, %v1607_v4 }
 0x15a   : > { %1626 = vpow2.f32 %v1407_v16  ;;  %v1611_v30 = vpop.eup %1610  ;;  %v1048_v55 = vadd.f32 1.0, %v1609_v5 }
 0x15b   : > { %1628 = vrcp.f32 %v1047_v49  ;;  %v1613_v18 = vpop.eup %1612  ;;  %v1112_v61 = vadd.f32 1.0, %v1611_v30 }
 0x15c   : > { %1630 = vrcp.f32 %v1111_v50  ;;  %v1173_v1 = vadd.f32 1.0, %v1613_v18 }
 0x15d   : > { %1632 = vrcp.f32 %v1048_v55 }
 0x15e   : > { %v1615_v35 = vpop.eup %1614  ;;  %1634 = vrcp.f32 %v1112_v61 }
 0x15f   : > { %v1617_v3 = vpop.eup %1616  ;;  %v996_v58 = vmul.f32 %v1615_v35, %v2121_v2  ;;  %1636 = vrcp.f32 %v1173_v1 }
 0x160   : > { %v1619_v6 = vpop.eup %1618  ;;  %v1057_v28 = vmul.f32 %v1617_v3, %v2058_v31  ;;  %1638 = vpow2.f32 %v1408_v62 }
 0x161   : > { %v1621_v7 = vpop.eup %1620  ;;  %v1121_v8 = vmul.f32 %v1619_v6, %v2062_v60  ;;  %1640 = vrcp.f32 %v2088_v56 }
 0x162   : > { %v1623_v36 = vpop.eup %1622  ;;  %v1061_v10 = vadd.f32 %v1057_v28, %v2096_v40  ;;  %v1058_v13 = vmul.f32 %v1621_v7, %v2077_v12 }
 0x163   : > { %v1625_v15 = vpop.eup %1624  ;;  %v1174_v37 = vadd.f32 1.0, %v1623_v36 }
 0x164   : > { %v1627_v19 = vpop.eup %1626  ;;  %v1125_v2 = vadd.f32 %v1121_v8, %v1061_v10  ;;  %v1062_v44 = vadd.f32 %v1058_v13, %v994_v20  ;;  %v1122_v21 = vmul.f32 %v1625_v15, %v2081_v17 }
 0x165   : > { %v1629_v31 = vpop.eup %1628  ;;  %1642 = vrcp.f32 %v1174_v37  ;;  %v1175_v57 = vadd.f32 1.0, %v1627_v19 }
 0x166   : > { %v1631_v22 = vpop.eup %1630  ;;  %v1126_v60 = vadd.f32 %v1122_v21, %v1062_v44  ;;  %v1059_v40 = vmul.f32 %v1629_v31, %v2105_v0 }
 0x167   : > { %v1633_v24 = vpop.eup %1632  ;;  %v1123_v12 = vmul.f32 %v1631_v22, %v2110_v46  ;;  %1644 = vrcp.f32 %v1175_v57 }
 0x168   : > { %v1635_v56 = vpop.eup %1634  ;;  %v1063_v26 = vadd.f32 %v1059_v40, %v995_v48  ;;  %v1060_v45 = vmul.f32 %v1633_v24, %v2125_v42  ;;  %1646 = vrcp.f32 %v2107_v25 }
 0x169   : > { %v1637_v20 = vpop.eup %1636  ;;  %v1124_v17 = vmul.f32 %v1635_v56, %v2132_v11  ;;  %1648 = vrcp.f32 %v2128_v29 }
 0x16a   : > { %v1639_v33 = vpop.eup %1638  ;;  %v1127_v34 = vadd.f32 %v1123_v12, %v1063_v26  ;;  %v1064_v38 = vadd.f32 %v1060_v45, %v996_v58  ;;  %v1185_v0 = vmul.f32 %v1637_v20, %v2068_v51 }
 0x16b   : > { %v1176_v46 = vadd.f32 1.0, %v1639_v33  ;;  %v1641_v59 = vpop.eup %1640 }
 0x16c   : > { %v1128_v39 = vadd.f32 %v1124_v17, %v1064_v38  ;;  %v1189_v41 = vadd.f32 %v1185_v0, %v1125_v2 }
 0x16d   : > { %1650 = vrcp.f32 %v1176_v46 }
 0x16e   : > { %v1213_v42 = vmul.f32 %v1641_v59, %v1189_v41  ;;  %1652 = vrcp.f32 %v2141_v32 }
 0x16f   : > { %v1643_v63 = vpop.eup %1642 }
 0x170   : > { %1217 = vst [vmem:[%s215_s7] sm:$0xff] %v1213_v42  ;;  %v1186_v25 = vmul.f32 %v1643_v63, %v2086_v53 }
 0x171   : > { %v1645_v11 = vpop.eup %1644 }
 0x172   : > { %v1190_v43 = vadd.f32 %v1186_v25, %v1126_v60  ;;  %v1187_v51 = vmul.f32 %v1645_v11, %v2114_v47  ;;  %v1647_v9 = vpop.eup %1646 }
 0x173   : > { %v1649_v48 = vpop.eup %1648 }
 0x174   : > { %v1214_v29 = vmul.f32 %v1647_v9, %v1190_v43  ;;  %v1191_v14 = vadd.f32 %v1187_v51, %v1127_v34 }
 0x176   : > { %1218 = vst [vmem:[%s215_s7 + $0x8] sm:$0xff] %v1214_v29  ;;  %v1215_v16 = vmul.f32 %v1649_v48, %v1191_v14 }
 0x177   : > { %v1651_v27 = vpop.eup %1650 }
 0x178   : > { %1219 = vst [vmem:[%s215_s7 + $0x10] sm:$0xff] %v1215_v16  ;;  %v1188_v23 = vmul.f32 %v1651_v27, %v2136_v52  ;;  %v1653_v54 = vpop.eup %1652 }
 0x17a   : > { %v1192_v53 = vadd.f32 %v1188_v23, %v1128_v39 }
 0x17c   : > { %v1216_v47 = vmul.f32 %v1653_v54, %v1192_v53 }
 0x17e   : > { %1220 = vst [vmem:[%s215_s7 + $0x18] sm:$0xff] %v1216_v47 }
 0x17f   : > { %1695 = shalt.err (!%p1692_p6)
}
 0x180   : > { %s1696_s30 = scalar_lea.hbm %s2171_s18, 512  ;;  %s1700_s27 = scalar_lea.hbm %s2226_s3, 2048 }
 0x181   : > { %p1697_p7 = scmp.ne.s32.totalorder %s2171_s18, %s1696_s30  ;;  %p1701_p0 = scmp.lt.u32.totalorder %s2171_s18, %s2226_s3 }
 0x182   : > { %p1702_p2 = scmp.lt.u32.totalorder %s1700_s27, %s1696_s30  ;;  %p1704_p8 = scmp.lt.u32.totalorder %s1696_s30, %s2171_s18 }
 0x183   : > { %p1698_p9 = pnand %p1697_p7, %p2238_p10 }
 0x184   : > { %p1703_p4 = por %p1702_p2, %p1701_p0 }
 0x185   : > { %p1699_p12 = pneg %p1698_p9 }
 0x186   : > { %p1705_p11 = por %p1704_p8, %p1703_p4 }
 0x188   : > { %p1706_p13 = pnand %p1705_p11, %p1699_p12 }
 0x18a   : > { %1709 = shalt.err (!%p1706_p13)
}
 0x18b   : > { %s1771_s6 = smov 256   ;;  %s1772_s7 = smov 16  }
 0x18c   : > { %1421 = dma.vmem_to_hbm [thread:$0]  (%p2238_p10), %s2173_s9, 512, %s2171_s18, %s2177_s19, %s1771_s6, %s1771_s6, %s1772_s7  }
 0x18d PF: > { %p1433_p1 = scmp.ge.s32.totalorder %s1764_s17, 2  ;;  %s1253_s8 = sand.u32 1, %s1744_s12  }
 0x18e   : > { %p2239_p3 = scmp.ne.s32.totalorder %s2232_s24, 0  ;;  %s1254_s10 = scalar_lea.sflag [#allocation4], %s1253_s8 }
 0x190   : > { %p1428_p5 = pnand %p1433_p1, %p2239_p3 }
 0x192   : > { %1739 = dma.done.wait (!%p1428_p5), %s1254_s10, 512  }
 0x193   : > { %1741 = vsyncadd (!%p1428_p5), %s1254_s10, 4294966784  ;;  %s17_s17 = sadd.s32 1, %s1764_s17   ;;  %s2240_s12 = smov %s1748_s13 }
 0x194   : > { %p14_p6 = scmp.ge.s32.totalorder %s17_s17, 6   ;;  %s2241_s13 = smov %s1752_s14 }
 0x195   : > { %s2242_s14 = smov %s1846_s25  ;;  %s2243_s15 = smov %s1760_s16 }
 0x196   : > { %s2244_s16 = smov %s2246_s20  ;;  %16 = sbr.rel (!%p14_p6) target bundleno = 5 (0x5), region = 76 }
 0x19d   :  { %1259 = vsyncpa [#allocation3], 1 }
 0x19e   :  { %1261 = vsyncpa [#allocation3 + $0x1], 1 }
 0x19f   :  { %1262 = vsyncpa [#allocation4], 1 }
 0x1a0   :  { %1264 = vsyncpa [#allocation4 + $0x1], 1 }

</bundles_post_ra>
